<compile_context>
chip_gen: v5e
topology: v5e:2x2
jax: 0.10.0
libtpu: 0.0.40
codegen_flags: <defaults>
</compile_context>

<pallas_src>
import jax
import jax.numpy as jnp
from jax.experimental import pallas as pl
from jax.experimental.pallas import tpu as pltpu


def _round_up(n, m):
    return ((n + m - 1) // m) * m


def _choose_row_tile(R8, Lp, itemsize):
    """Pick a row tile TR (multiple of 8, divides R8) from a VMEM budget."""
    # Per grid step we hold one (TR, Lp) input tile + one (TR, Lp) output tile
    # (single-buffered); Pallas double-buffers on top of this.
    per_row_bytes = 2 * Lp * itemsize
    tr_budget = max(8, ((8 * 1024 * 1024) // per_row_bytes) // 8 * 8)
    # Aim for >= ~8 grid steps on large inputs (pipelining + megacore).
    tr_steps = _round_up(max(R8 // 8, 8), 8) if R8 >= 64 else R8
    TR = min(R8, 1024, tr_budget, tr_steps)
    TR = max(8, (TR // 8) * 8)
    while R8 % TR:          # terminates: TR=8 always divides R8
        TR -= 8
    return TR


def _share_sep_conv_kernel(w_ref, x_ref, out_ref):
    # w_ref:   SMEM (K,)       shared taps (f32 scalars)
    # x_ref:   VMEM (TR, Lp)   rows in native dtype, lane-dense (Lp % 128 == 0)
    # out_ref: VMEM (TR, Lp)   native dtype
    K = w_ref.shape[0]
    TR, Lp = out_ref.shape

    x = x_ref[...].astype(jnp.float32)                 # upcast in-register only
    taps = [w_ref[k] for k in range(K)]                # hoisted scalar reads
    lane = jax.lax.broadcasted_iota(jnp.int32, (TR, Lp), 1)  # hoisted once

    acc = taps[K - 1] * x                              # shift-0 tap
    for k in range(K - 1):                             # K is tiny & static
        s = (K - 1) - k                                # causal right shift
        rolled = pltpu.roll(x, s, axis=1)              # XLU lane rotate
        acc = acc + taps[k] * jnp.where(lane >= s, rolled, 0.0)

    out_ref[...] = acc.astype(out_ref.dtype)


def share_sep_conv(x, weight):
    """x: (N, C, L); weight: torch-like (1,1,K) or flat (K,) shared taps."""
    w = jnp.asarray(weight, jnp.float32).reshape(-1)
    K = int(w.shape[0])
    N, C, L = x.shape
    R = N * C
    dt = x.dtype
    itemsize = jnp.dtype(dt).itemsize

    # Lane-align the time axis; right padding with zeros never affects the
    # causal outputs at t < L (the conv only looks left).
    Lp = _round_up(L, 128)
    R8 = _round_up(R, 8)
    TR = _choose_row_tile(R8, Lp, itemsize)
    Rp = R8                                            # TR divides R8

    xr = x.reshape(R, L)
    if (Rp != R) or (Lp != L):
        # Edge-case pad only (native dtype); the common 128-aligned,
        # 8-row-multiple path does no host-side copy at all.
        xr = jnp.pad(xr, ((0, Rp - R), (0, Lp - L)))

    out = pl.pallas_call(
        _share_sep_conv_kernel,
        out_shape=jax.ShapeDtypeStruct((Rp, Lp), dt),
        grid_spec=pltpu.PrefetchScalarGridSpec(
            num_scalar_prefetch=0,
            grid=(Rp // TR,),
            in_specs=[
                pl.BlockSpec(memory_space=pltpu.MemorySpace.SMEM),  # K taps
                pl.BlockSpec((TR, Lp), lambda r: (r, 0)),
            ],
            out_specs=pl.BlockSpec((TR, Lp), lambda r: (r, 0)),
        ),
        compiler_params=pltpu.CompilerParams(
            dimension_semantics=("parallel",),
            vmem_limit_bytes=32 * 1024 * 1024),
    )(w, xr)
    return out[:R, :L].reshape(N, C, L)


def _reference(x, w):
    """Depthwise lax.conv reference matching F.conv1d(groups=C)."""
    N, C, L = x.shape
    K = w.shape[0]
    xp = jnp.pad(x.astype(jnp.float32), ((0, 0), (0, 0), (K - 1, 0)))
    wf = jnp.broadcast_to(w.reshape(1, 1, K), (C, 1, K)).astype(jnp.float32)
    return jax.lax.conv_general_dilated(
        xp, wf, window_strides=(1,), padding="VALID",
        dimension_numbers=("NCH", "OIH", "NCH"), feature_group_count=C)


if __name__ == "__main__":
    key = jax.random.PRNGKey(0)
    kx, kw, kx2 = jax.random.split(key, 3)

    K = 5
    # torch default init for ShareSepConv: one-hot tap at (K-1)//2
    w_default = jnp.zeros((K,), jnp.float32).at[(K - 1) // 2].set(1.0)
    w_random = jax.random.normal(kw, (K,), jnp.float32)

    # main case: batch=2, channels=4, lane-dense length 128 (no host-side pad)
    x = jax.random.normal(kx, (2, 4, 128), jnp.float32)
    for w in (w_default, w_random):
        out = share_sep_conv(x, w)
        jax.block_until_ready(out)
        assert out.shape == x.shape and out.dtype == x.dtype
        assert jnp.allclose(out, _reference(x, w), atol=1e-5, rtol=1e-5)

    # default (one-hot) weight == pure right shift by (K-1) - (K-1)//2 samples
    shift = (K - 1) - (K - 1) // 2
    out_d = share_sep_conv(x, w_default)
    assert jnp.allclose(out_d[:, :, shift:], x[:, :, : x.shape[-1] - shift],
                        atol=1e-6)
    assert jnp.allclose(out_d[:, :, :shift], 0.0, atol=1e-6)

    # native-dtype path: bf16 in -> bf16 out, f32 accumulation in-register
    xb = x.astype(jnp.bfloat16)
    outb = share_sep_conv(xb, w_random)
    jax.block_until_ready(outb)
    assert outb.dtype == jnp.bfloat16
    assert jnp.allclose(outb.astype(jnp.float32),
                        _reference(xb.astype(jnp.float32), w_random),
                        atol=2e-2, rtol=2e-2)

    # odd shape: exercises the edge-case row pad (N*C=3 -> 8) and L=70 -> 128
    x2 = jax.random.normal(kx2, (1, 3, 70), jnp.float32)
    out2 = share_sep_conv(x2, w_random)
    jax.block_until_ready(out2)
    assert jnp.allclose(out2, _reference(x2, w_random), atol=1e-5, rtol=1e-5)

    print("KERNEL_OK")
</pallas_src>

<mosaic_0001>
module attributes {stable_mosaic.version = 11 : i64} {
  func.func @_share_sep_conv_kernel(%arg0: i32, %arg1: memref<5xf32, #tpu.memory_space<smem>>, %arg2: memref<8x128xf32, #tpu.memory_space<vmem>>, %arg3: memref<8x128xf32, #tpu.memory_space<vmem>>) attributes {dimension_semantics = [#tpu.dimension_semantics<parallel>], iteration_bounds = array<i64: 1>, scalar_prefetch = 0 : i64, scratch_operands = 0 : i64, tpu.core_type = #tpu.core_type<tc>, window_params = [{transform_indices = @transform_0, window_bounds = array<i64: 5>}, {transform_indices = @transform_1, window_bounds = array<i64: 8, 128>}, {transform_indices = @transform_2, window_bounds = array<i64: 8, 128>}]} {
    %c0 = arith.constant 0 : index
    %c0_0 = arith.constant 0 : index
    %0 = vector.load %arg2[%c0, %c0_0] : memref<8x128xf32, #tpu.memory_space<vmem>>, vector<8x128xf32>
    %c0_1 = arith.constant 0 : index
    %1 = memref.load %arg1[%c0_1] : memref<5xf32, #tpu.memory_space<smem>>
    %c1 = arith.constant 1 : index
    %2 = memref.load %arg1[%c1] : memref<5xf32, #tpu.memory_space<smem>>
    %c2 = arith.constant 2 : index
    %3 = memref.load %arg1[%c2] : memref<5xf32, #tpu.memory_space<smem>>
    %c3 = arith.constant 3 : index
    %4 = memref.load %arg1[%c3] : memref<5xf32, #tpu.memory_space<smem>>
    %c4 = arith.constant 4 : index
    %5 = memref.load %arg1[%c4] : memref<5xf32, #tpu.memory_space<smem>>
    %6 = tpu.iota {dimensions = array<i32: 1>} : vector<8x128xi32>
    %7 = vector.broadcast %5 : f32 to vector<8x128xf32>
    %8 = arith.mulf %7, %0 : vector<8x128xf32>
    %c4_i32 = arith.constant 4 : i32
    %9 = tpu.dynamic_rotate %0 by %c4_i32 dim 1 : vector<8x128xf32>, i32 -> vector<8x128xf32>
    %c4_i32_2 = arith.constant 4 : i32
    %10 = vector.broadcast %c4_i32_2 : i32 to vector<8x128xi32>
    %11 = arith.cmpi sge, %6, %10 : vector<8x128xi32>
    %cst = arith.constant 0.000000e+00 : f32
    %12 = vector.broadcast %cst : f32 to vector<8x128xf32>
    %13 = arith.select %11, %9, %12 : vector<8x128xi1>, vector<8x128xf32>
    %14 = vector.broadcast %1 : f32 to vector<8x128xf32>
    %15 = arith.mulf %14, %13 : vector<8x128xf32>
    %16 = arith.addf %8, %15 : vector<8x128xf32>
    %c3_i32 = arith.constant 3 : i32
    %17 = tpu.dynamic_rotate %0 by %c3_i32 dim 1 : vector<8x128xf32>, i32 -> vector<8x128xf32>
    %c3_i32_3 = arith.constant 3 : i32
    %18 = vector.broadcast %c3_i32_3 : i32 to vector<8x128xi32>
    %19 = arith.cmpi sge, %6, %18 : vector<8x128xi32>
    %cst_4 = arith.constant 0.000000e+00 : f32
    %20 = vector.broadcast %cst_4 : f32 to vector<8x128xf32>
    %21 = arith.select %19, %17, %20 : vector<8x128xi1>, vector<8x128xf32>
    %22 = vector.broadcast %2 : f32 to vector<8x128xf32>
    %23 = arith.mulf %22, %21 : vector<8x128xf32>
    %24 = arith.addf %16, %23 : vector<8x128xf32>
    %c2_i32 = arith.constant 2 : i32
    %25 = tpu.dynamic_rotate %0 by %c2_i32 dim 1 : vector<8x128xf32>, i32 -> vector<8x128xf32>
    %c2_i32_5 = arith.constant 2 : i32
    %26 = vector.broadcast %c2_i32_5 : i32 to vector<8x128xi32>
    %27 = arith.cmpi sge, %6, %26 : vector<8x128xi32>
    %cst_6 = arith.constant 0.000000e+00 : f32
    %28 = vector.broadcast %cst_6 : f32 to vector<8x128xf32>
    %29 = arith.select %27, %25, %28 : vector<8x128xi1>, vector<8x128xf32>
    %30 = vector.broadcast %3 : f32 to vector<8x128xf32>
    %31 = arith.mulf %30, %29 : vector<8x128xf32>
    %32 = arith.addf %24, %31 : vector<8x128xf32>
    %c1_i32 = arith.constant 1 : i32
    %33 = tpu.dynamic_rotate %0 by %c1_i32 dim 1 : vector<8x128xf32>, i32 -> vector<8x128xf32>
    %c1_i32_7 = arith.constant 1 : i32
    %34 = vector.broadcast %c1_i32_7 : i32 to vector<8x128xi32>
    %35 = arith.cmpi sge, %6, %34 : vector<8x128xi32>
    %cst_8 = arith.constant 0.000000e+00 : f32
    %36 = vector.broadcast %cst_8 : f32 to vector<8x128xf32>
    %37 = arith.select %35, %33, %36 : vector<8x128xi1>, vector<8x128xf32>
    %38 = vector.broadcast %4 : f32 to vector<8x128xf32>
    %39 = arith.mulf %38, %37 : vector<8x128xf32>
    %40 = arith.addf %32, %39 : vector<8x128xf32>
    %c0_9 = arith.constant 0 : index
    %c0_10 = arith.constant 0 : index
    %41 = vector.load %arg3[%c0_9, %c0_10] : memref<8x128xf32, #tpu.memory_space<vmem>>, vector<8x128xf32>
    tpu.vector_store %arg3[%c0_9, %c0_10], %40 {strides = array<i32>} : memref<8x128xf32, #tpu.memory_space<vmem>>, vector<8x128xf32>,
    return
  }
  func.func @transform_0(%arg0: i32) -> i32 {
    %c0_i32 = arith.constant 0 : i32
    %c0_i32_0 = arith.constant 0 : i32
    return %c0_i32 : i32
  }
  func.func @transform_1(%arg0: i32) -> (i32, i32) {
    %c0_i32 = arith.constant 0 : i32
    %c0_i32_0 = arith.constant 0 : i32
    return %arg0, %c0_i32 : i32, i32
  }
  func.func @transform_2(%arg0: i32) -> (i32, i32) {
    %c0_i32 = arith.constant 0 : i32
    %c0_i32_0 = arith.constant 0 : i32
    return %arg0, %c0_i32 : i32, i32
  }
}

</mosaic_0001>

<bundles_post_ra>
// kernel: tpu_custom_call.1
= control target key start
LH: loop header
LB: loop body
LE: loop exit
PB: predicated region body
PF: predicated region fallthrough
CT: control target
= control target key end

     0   :  { %7 = vsyncpa [#allocation5], 0  ;;  %s204_s0 = inlined_call_operand.hbm [shape: f32[5], index: 0, kind: input, shape index: {}]   ;;  %s205_s1 = inlined_call_operand.hbm [shape: f32[8,128], index: 1, kind: input, shape index: {}]   ;;  %s206_s2 = inlined_call_operand.hbm [shape: f32[8,128], index: 2, kind: output, shape index: {}]  }
   0x1   :  { %8 = vsyncpa [#allocation3], 0 }
   0x2   :  { %9 = vsyncpa [#allocation4], 0  ;;  %s15_s11 = sshll.u32 %s204_s0, 4  ;;  %s24_s14 = sshll.u32 %s205_s1, 4  ;;  %s16_s11 = int_to_ptr.hbm [resolvable:$true] %s15_s11  ;;  %s25_s14 = int_to_ptr.hbm [resolvable:$true] %s24_s14 }
   0x3   :  { %s173_s15 = smov [#allocation2]   ;;  %s174_s16 = smov [#allocation6]  }
   0x4   :  { %18 = dma.hbm_to_smem %s16_s11, 16, %s173_s15, [#allocation5]  }
   0x5   :  { %s26_s17 = sshll.u32 %s174_s16, 4  ;;  %s27_s17 = int_to_ptr.vmem [resolvable:$true] %s26_s17 }
   0x6   :  { %29 = dma.hbm_to_vmem [thread:$0]  %s25_s14, 128, %s27_s17, [#allocation3]  }
   0x7   :  { %167 = dma.done.wait [#allocation5], 16  }
   0x8   :  { %168 = vsyncadd [#allocation5], 4294967280 }
   0x9   :  { %169 = dma.done.wait [#allocation3], 128  }
   0xa   :  { %170 = vsyncadd [#allocation3], 4294967168 }
   0xb   :  { %38 = sfence }
   0xc   :  { %v39_v0 = vld [vmem:[#allocation6] sm:$0xff]  ;;  %s175_s18 = smov 4   ;;  %s176_s0 = smov 2   ;;  %v45_v1 = vlaneseq }
   0xd   :  { %49 = vrot.lane.b32.xlu0 %v39_v0, %s175_s18  ;;  %63 = vrot.lane.b32.xlu1 %v39_v0, %s176_s0  ;;  %s177_s19 = smov 3   ;;  %s178_s1 = smov 1  }
   0xe   :  { %s99_s20 = sld [smem:[#allocation2 + $0x4]]  ;;  %v46_v2 = vand.u32 127, %v45_v1  ;;  %s179_s25 = smov [#allocation7]  }
   0xf   :  { %s40_s21 = sld [smem:[#allocation2]]  ;;  %s83_s26 = sshll.u32 %s179_s25, 4  ;;  %s84_s26 = int_to_ptr.vmem [resolvable:$true] %s83_s26 }
  0x10   :  { %s96_s22 = sld [smem:[#allocation2 + $0x1]]  ;;  %vm51_vm0 = vcmp.ge.s32.totalorder %v46_v2, 4  ;;  %vm65_vm1 = vcmp.ge.s32.totalorder %v46_v2, 2  ;;  %vm58_vm2 = vcmp.ge.s32.totalorder %v46_v2, 3  ;;  %vm72_vm3 = vcmp.ge.s32.totalorder %v46_v2, 1  ;;  %s85_s29 = sshll.u32 %s206_s2, 4  ;;  %s86_s29 = int_to_ptr.hbm [resolvable:$true] %s85_s29 }
  0x11   :  { %s97_s23 = sld [smem:[#allocation2 + $0x2]] }
  0x12   :  { %s98_s24 = sld [smem:[#allocation2 + $0x3]] }
  0x14   :  { %v47_v5 = vstv %s99_s20 }
  0x15   :  { %56 = vrot.lane.b32.xlu0 %v39_v0, %s177_s19  ;;  %70 = vrot.lane.b32.xlu1 %v39_v0, %s178_s1  ;;  %v53_v6 = vstv %s40_s21  ;;  %v48_v8 = vmul.f32 %v47_v5, %v39_v0 }
  0x16   :  { %v60_v10 = vstv %s96_s22 }
  0x17   :  { %v67_v11 = vstv %s97_s23 }
  0x18   :  { %v74_v16 = vstv %s98_s24 }
  0x7f   :  { %v50_v3 = vpop.permute.xlu0 %49  ;;  %v64_v4 = vpop.permute.xlu1 %63 }
  0x80   :  { %v52_v7 = vsel %vm51_vm0, %v50_v3, 0.0  ;;  %v66_v14 = vsel %vm65_vm1, %v64_v4, 0.0 }
  0x81   :  { %v54_v9 = vmul.f32 %v53_v6, %v52_v7  ;;  %v68_v20 = vmul.f32 %v67_v11, %v66_v14 }
  0x83   :  { %v55_v18 = vadd.f32 %v54_v9, %v48_v8 }
  0x87   :  { %v57_v12 = vpop.permute.xlu0 %56  ;;  %v71_v13 = vpop.permute.xlu1 %70 }
  0x88   :  { %v59_v15 = vsel %vm58_vm2, %v57_v12, 0.0  ;;  %v73_v17 = vsel %vm72_vm3, %v71_v13, 0.0 }
  0x89   :  { %v61_v19 = vmul.f32 %v60_v10, %v59_v15  ;;  %v75_v22 = vmul.f32 %v74_v16, %v73_v17 }
  0x8b   :  { %v62_v21 = vadd.f32 %v61_v19, %v55_v18 }
  0x8d   :  { %v69_v23 = vadd.f32 %v68_v20, %v62_v21 }
  0x8f   :  { %v76_v24 = vadd.f32 %v75_v22, %v69_v23 }
  0x91   :  { %77 = vst [vmem:[#allocation7] sm:$0xff] %v76_v24 }
  0x92   :  { %88 = dma.vmem_to_hbm [thread:$0]  %s84_s26, 128, %s86_s29, [#allocation4]  }
  0x93   :  { %171 = dma.done.wait [#allocation4], 128  }
  0x94   :  { %172 = vsyncadd [#allocation4], 4294967168 }
  0x95   :  { %93 = vsyncpa [#allocation3], 1 }
  0x96   :  { %94 = vsyncpa [#allocation4], 1 }
  0x97   :  { %95 = vsyncpa [#allocation5], 1 }

</bundles_post_ra>
